<compile_context>
chip_gen: v6e
topology: v6e:2x2x1
jax: 0.10.0
libtpu: 0.0.40
codegen_flags: <defaults>
</compile_context>

<pallas_src>
import functools

import jax
import jax.numpy as jnp
from jax.experimental import pallas as pl
from jax.experimental.pallas import tpu as pltpu


def _round_up(v: int, m: int) -> int:
    return ((v + m - 1) // m) * m


# ----------------------------- Pallas kernel ---------------------------------
def ffn_kernel(x_ref, w1_ref, w2_ref, b_ref, out_ref, *, nh):
    """One (stream, token-tile): out = relu(x @ W1p + b1p) @ W2p + b2p (lane-dense)."""
    x = x_ref[0]                                    # (tT, NE) bf16
    b1 = b_ref[0, :, :nh]                           # (1, NH)  f32
    b2 = b_ref[0, :, nh:]                           # (1, NE)  f32

    # Linear 1 + ReLU: bf16 operands into the MXU, f32 accumulation, f32 elementwise.
    h = jnp.dot(x, w1_ref[0], preferred_element_type=jnp.float32) + b1      # (tT, NH)
    h = jnp.maximum(h, 0.0)

    # Linear 2 (output columns >= E are zero-padded weight columns -> zeros).
    o = jnp.dot(h.astype(jnp.bfloat16), w2_ref[0],
                preferred_element_type=jnp.float32) + b2                    # (tT, NE)

    out_ref[0] = o.astype(out_ref.dtype)            # full-lane (tT, NE) store


# ----------------------- one-time parameter packing ---------------------------
def prepare_ffn_params(params_list, embed_dim, hidden_dim):
    """Hoisted out of the per-call forward: transpose, zero-pad to lane multiples,
    cast weights to bf16, pack biases.  Call ONCE at parameter-load time."""
    E, H = embed_dim, hidden_dim
    NE = _round_up(E, 128)          # lane-dense padded embed width (in + out)
    NH = _round_up(H, 128)          # lane-dense padded hidden width

    w1_list, w2_list, b_list = [], [], []
    for p in params_list:
        # W1: (E, NH) padded on BOTH the contraction rows (E -> NE) and hidden cols.
        w1 = jnp.zeros((NE, NH), jnp.float32).at[:E, :H].set(p["W1"].T)
        # W2: (NH, NE) padded hidden rows and output cols.
        w2 = jnp.zeros((NH, NE), jnp.float32).at[:H, :E].set(p["W2"].T)
        b = jnp.zeros((1, NH + NE), jnp.float32)
        b = b.at[0, :H].set(p["b1"]).at[0, NH:NH + E].set(p["b2"])
        w1_list.append(w1.astype(jnp.bfloat16))
        w2_list.append(w2.astype(jnp.bfloat16))
        b_list.append(b)

    w1s = jnp.stack(w1_list, 0)     # (P, NE, NH)   bf16
    w2s = jnp.stack(w2_list, 0)     # (P, NH, NE)   bf16
    bs = jnp.stack(b_list, 0)       # (P, 1, NH+NE) f32
    return w1s, w2s, bs


# ----------------------------- forward (jitted) --------------------------------
@functools.partial(jax.jit, static_argnames=("token_tile",))
def feedforward_parallel(x_parallel, w1s, w2s, bs, *, token_tile=256):
    """x_parallel: list of (B, S, E) f32; w1s/w2s/bs from prepare_ffn_params."""
    P = len(x_parallel)
    B, S, E = x_parallel[0].shape
    T = B * S
    NE = w1s.shape[1]               # padded embed width  (contraction & output)
    NH = w1s.shape[2]               # padded hidden width

    # Token tile: multiple of 8 (sublane), capped at the (padded) token count.
    tT = min(token_tile, _round_up(T, 8))
    Tp = _round_up(T, tT)

    # Flatten tokens, stack streams, cast ONCE to bf16, lane/sublane zero-pad.
    x = jnp.stack([xi.reshape(T, E) for xi in x_parallel], 0).astype(jnp.bfloat16)
    x = jnp.pad(x, ((0, 0), (0, Tp - T), (0, NE - E)))          # (P, Tp, NE) bf16

    kernel = functools.partial(ffn_kernel, nh=NH)
    n_tiles = pl.cdiv(Tp, tT)

    cost = pl.CostEstimate(
        flops=2 * P * Tp * (NE * NH + NH * NE),
        transcendentals=0,
        bytes_accessed=(x.size * 2 + w1s.size * 2 + w2s.size * 2 + bs.size * 4
                        + P * Tp * NE * 4),
    )

    out = pl.pallas_call(
        kernel,
        out_shape=jax.ShapeDtypeStruct((P, Tp, NE), jnp.float32),
        grid=(P, n_tiles),
        in_specs=[
            pl.BlockSpec((1, tT, NE), lambda p, t: (p, t, 0)),        # x tile (bf16)
            pl.BlockSpec((1, NE, NH), lambda p, t: (p, 0, 0)),        # W1 resident
            pl.BlockSpec((1, NH, NE), lambda p, t: (p, 0, 0)),        # W2 resident
            pl.BlockSpec((1, 1, NH + NE), lambda p, t: (p, 0, 0)),    # packed biases
        ],
        out_specs=pl.BlockSpec((1, tT, NE), lambda p, t: (p, t, 0)),
        compiler_params=pltpu.CompilerParams(
            dimension_semantics=("parallel", "parallel")),            # megacore over P x tiles
        cost_estimate=cost,
    )(x, w1s, w2s, bs)

    # Drop the lane/token padding and restore (B, S, E) per stream.
    return [out[i, :T, :E].reshape(B, S, E) for i in range(P)]


# ----------------------------- params & reference -----------------------------
def init_ffn_params(key, E, H):
    """Matches torch.nn.Linear default init: uniform(-1/sqrt(fan_in), 1/sqrt(fan_in))."""
    def lin(k, out_dim, in_dim):
        k1, k2 = jax.random.split(k)
        bound = 1.0 / (in_dim ** 0.5)
        W = jax.random.uniform(k1, (out_dim, in_dim), jnp.float32, -bound, bound)
        b = jax.random.uniform(k2, (out_dim,), jnp.float32, -bound, bound)
        return W, b

    k1, k2 = jax.random.split(key)
    W1, b1 = lin(k1, H, E)
    W2, b2 = lin(k2, E, H)
    return dict(W1=W1, b1=b1, W2=W2, b2=b2)


def ref_ffn(x, p):
    h = jnp.maximum(x @ p["W1"].T + p["b1"], 0.0)
    return h @ p["W2"].T + p["b2"]


# ----------------------------------- main --------------------------------------
if __name__ == "__main__":
    EMBED, HIDDEN, PARALLEL = 32, 64, 2
    B, S = 2, 8

    key = jax.random.PRNGKey(0)
    key, *xkeys = jax.random.split(key, PARALLEL + 1)
    x_parallel = [jax.random.normal(k, (B, S, EMBED), jnp.float32) for k in xkeys]

    params = []
    for _ in range(PARALLEL):
        key, sub = jax.random.split(key)
        params.append(init_ffn_params(sub, EMBED, HIDDEN))

    # One-time weight packing (outside the jitted per-call forward).
    w1s, w2s, bs = prepare_ffn_params(params, EMBED, HIDDEN)
    w1s, w2s, bs = map(jax.block_until_ready, (w1s, w2s, bs))

    # Pallas forward
    outs = feedforward_parallel(x_parallel, w1s, w2s, bs)
    outs = [jax.block_until_ready(o) for o in outs]

    # Pure-JAX f32 reference.  The kernel intentionally uses bf16 operands at the
    # MXU (f32 accumulation) -> loose tolerance is an accepted precision tradeoff.
    refs = [ref_ffn(x_parallel[i], params[i]) for i in range(PARALLEL)]
    for o, r in zip(outs, refs):
        err = float(jnp.max(jnp.abs(o - r)))
        assert jnp.allclose(o, r, atol=3e-2, rtol=3e-2), f"max abs err {err}"

    print("KERNEL_OK")
</pallas_src>

<mosaic_0001>
module attributes {stable_mosaic.version = 11 : i64} {
  func.func @ffn_kernel(%arg0: i32, %arg1: i32, %arg2: memref<1x16x128xbf16, #tpu.memory_space<vmem>>, %arg3: memref<1x128x128xbf16, #tpu.memory_space<vmem>>, %arg4: memref<1x128x128xbf16, #tpu.memory_space<vmem>>, %arg5: memref<1x1x256xf32, #tpu.memory_space<vmem>>, %arg6: memref<1x16x128xf32, #tpu.memory_space<vmem>>) attributes {dimension_semantics = [#tpu.dimension_semantics<parallel>, #tpu.dimension_semantics<parallel>], iteration_bounds = array<i64: 2, 1>, scalar_prefetch = 0 : i64, scratch_operands = 0 : i64, tpu.core_type = #tpu.core_type<tc>, window_params = [{transform_indices = @transform_0, window_bounds = array<i64: 1, 16, 128>}, {transform_indices = @transform_1, window_bounds = array<i64: 1, 128, 128>}, {transform_indices = @transform_2, window_bounds = array<i64: 1, 128, 128>}, {transform_indices = @transform_3, window_bounds = array<i64: 1, 1, 256>}, {transform_indices = @transform_4, window_bounds = array<i64: 1, 16, 128>}]} {
    %c0 = arith.constant 0 : index
    %c0_0 = arith.constant 0 : index
    %c0_1 = arith.constant 0 : index
    %0 = vector.load %arg2[%c0, %c0_0, %c0_1] : memref<1x16x128xbf16, #tpu.memory_space<vmem>>, vector<1x16x128xbf16>
    %1 = vector.shape_cast %0 : vector<1x16x128xbf16> to vector<16x128xbf16>
    %c0_2 = arith.constant 0 : index
    %c0_3 = arith.constant 0 : index
    %c0_4 = arith.constant 0 : index
    %2 = vector.load %arg5[%c0_2, %c0_3, %c0_4] : memref<1x1x256xf32, #tpu.memory_space<vmem>>, vector<1x1x128xf32>
    %3 = vector.shape_cast %2 : vector<1x1x128xf32> to vector<1x128xf32>
    %c0_5 = arith.constant 0 : index
    %c0_6 = arith.constant 0 : index
    %c128 = arith.constant 128 : index
    %4 = vector.load %arg5[%c0_5, %c0_6, %c128] : memref<1x1x256xf32, #tpu.memory_space<vmem>>, vector<1x1x128xf32>
    %5 = vector.shape_cast %4 : vector<1x1x128xf32> to vector<1x128xf32>
    %c0_7 = arith.constant 0 : index
    %c0_8 = arith.constant 0 : index
    %c0_9 = arith.constant 0 : index
    %6 = vector.load %arg3[%c0_7, %c0_8, %c0_9] : memref<1x128x128xbf16, #tpu.memory_space<vmem>>, vector<1x128x128xbf16>
    %7 = vector.shape_cast %6 : vector<1x128x128xbf16> to vector<128x128xbf16>
    %cst = arith.constant dense<0.000000e+00> : vector<16x128xf32>
    %8 = tpu.matmul %1, %7, %cst {dimension_numbers = #tpu.dot_dimension_numbers<[1], [0], [0], [1], [0, 0, 1, 1], [], []>} : vector<16x128xbf16>, vector<128x128xbf16>, vector<16x128xf32> -> vector<16x128xf32>
    %9 = vector.broadcast %3 : vector<1x128xf32> to vector<16x128xf32>
    %10 = arith.addf %8, %9 : vector<16x128xf32>
    %cst_10 = arith.constant 0.000000e+00 : f32
    %11 = vector.broadcast %cst_10 : f32 to vector<16x128xf32>
    %12 = arith.maximumf %10, %11 : vector<16x128xf32>
    %13 = arith.truncf %12 : vector<16x128xf32> to vector<16x128xbf16>
    %c0_11 = arith.constant 0 : index
    %c0_12 = arith.constant 0 : index
    %c0_13 = arith.constant 0 : index
    %14 = vector.load %arg4[%c0_11, %c0_12, %c0_13] : memref<1x128x128xbf16, #tpu.memory_space<vmem>>, vector<1x128x128xbf16>
    %15 = vector.shape_cast %14 : vector<1x128x128xbf16> to vector<128x128xbf16>
    %cst_14 = arith.constant dense<0.000000e+00> : vector<16x128xf32>
    %16 = tpu.matmul %13, %15, %cst_14 {dimension_numbers = #tpu.dot_dimension_numbers<[1], [0], [0], [1], [0, 0, 1, 1], [], []>} : vector<16x128xbf16>, vector<128x128xbf16>, vector<16x128xf32> -> vector<16x128xf32>
    %17 = vector.broadcast %5 : vector<1x128xf32> to vector<16x128xf32>
    %18 = arith.addf %16, %17 : vector<16x128xf32>
    %c0_15 = arith.constant 0 : index
    %c0_16 = arith.constant 0 : index
    %c0_17 = arith.constant 0 : index
    %19 = vector.load %arg6[%c0_15, %c0_16, %c0_17] : memref<1x16x128xf32, #tpu.memory_space<vmem>>, vector<1x16x128xf32>
    %20 = vector.shape_cast %19 : vector<1x16x128xf32> to vector<16x128xf32>
    %21 = vector.shape_cast %18 : vector<16x128xf32> to vector<1x16x128xf32>
    tpu.vector_store %arg6[%c0_15, %c0_16, %c0_17], %21 {strides = array<i32>} : memref<1x16x128xf32, #tpu.memory_space<vmem>>, vector<1x16x128xf32>,
    return
  }
  func.func @transform_0(%arg0: i32, %arg1: i32) -> (i32, i32, i32) {
    %c0_i32 = arith.constant 0 : i32
    %c0_i32_0 = arith.constant 0 : i32
    return %arg0, %arg1, %c0_i32 : i32, i32, i32
  }
  func.func @transform_1(%arg0: i32, %arg1: i32) -> (i32, i32, i32) {
    %c0_i32 = arith.constant 0 : i32
    %c0_i32_0 = arith.constant 0 : i32
    %c0_i32_1 = arith.constant 0 : i32
    return %arg0, %c0_i32, %c0_i32_0 : i32, i32, i32
  }
  func.func @transform_2(%arg0: i32, %arg1: i32) -> (i32, i32, i32) {
    %c0_i32 = arith.constant 0 : i32
    %c0_i32_0 = arith.constant 0 : i32
    %c0_i32_1 = arith.constant 0 : i32
    return %arg0, %c0_i32, %c0_i32_0 : i32, i32, i32
  }
  func.func @transform_3(%arg0: i32, %arg1: i32) -> (i32, i32, i32) {
    %c0_i32 = arith.constant 0 : i32
    %c0_i32_0 = arith.constant 0 : i32
    %c0_i32_1 = arith.constant 0 : i32
    return %arg0, %c0_i32, %c0_i32_0 : i32, i32, i32
  }
  func.func @transform_4(%arg0: i32, %arg1: i32) -> (i32, i32, i32) {
    %c0_i32 = arith.constant 0 : i32
    %c0_i32_0 = arith.constant 0 : i32
    return %arg0, %arg1, %c0_i32 : i32, i32, i32
  }
}

</mosaic_0001>

<bundles_post_ra>
// kernel: feedforward_parallel.1
= control target key start
LH: loop header
LB: loop body
LE: loop exit
PB: predicated region body
PF: predicated region fallthrough
CT: control target
= control target key end

     0   :  { %9 = vsyncpa [#allocation3], 0  ;;  %s1202_s0 = inlined_call_operand.vmem [shape: bf16[2,16,128], index: 0, kind: input, shape index: {}]   ;;  %s1203_s1 = inlined_call_operand.hbm [shape: bf16[2,128,128], index: 1, kind: input, shape index: {}]   ;;  %s1204_s2 = inlined_call_operand.hbm [shape: bf16[2,128,128], index: 2, kind: input, shape index: {}]   ;;  %s1205_s3 = inlined_call_operand.vmem [shape: f32[2,1,256], index: 3, kind: input, shape index: {}]   ;;  %s1206_s4 = inlined_call_operand.vmem [shape: f32[2,16,128], index: 4, kind: output, shape index: {}]  }
   0x1   :  { %11 = vsyncpa [#allocation3 + $0x1], 0 }
   0x2   :  { %12 = vsyncpa [#allocation5], 0 }
   0x3   :  { %14 = vsyncpa [#allocation5 + $0x1], 0  ;;  %s1042_s15 = smov 0   ;;  %s1044_s16 = smov 0  }
   0x4   :  { %s1046_s17 = smov 0   ;;  %s1048_s18 = smov 0  }
   0x5   :  { %s1050_s19 = smov 0   ;;  %s1052_s20 = smov 0  }
   0x6 LB: > { %s717_s21 = sadd.s32 4294967295, %s1009_s20   ;;  %s32_s22 = sadd.s32 1, %s1005_s19  ;;  %s1009_s20 = sphi %s1052_s20, %s20_s20   ;;  %s1005_s19 = sphi %s1050_s19, %s1215_s19   ;;  %s1001_s18 = sphi %s1048_s18, %s1214_s18   ;;  %s997_s17 = sphi %s1046_s17, %s1213_s17   ;;  %s993_s16 = sphi %s1044_s16, %s1212_s16   ;;  %s989_s15 = sphi %s1042_s15, %s1211_s15  }
   0x7   : > { %p34_p0 = scmp.ge.s32.totalorder %s32_s22, 2  ;;  %s67_s23 = sadd.s32 1, %s997_s17 }
   0x8   : > { %p74_p1 = scmp.ne.s32.totalorder %s997_s17, %s993_s16  ;;  %p75_p2 = scmp.eq.s32.totalorder %s1009_s20, 0 }
   0x9   : > { %s1217_s22 = smov (%p34_p0, %s32_s22), 0  ;;  %p80_p4 = scmp.ne.s32.totalorder %s993_s16, %s989_s15 }
   0xa   : > { %p1078_p3 = por %p75_p2, %p74_p1  ;;  %s64_s25 = ssub.s32 %s1005_s19, %s1217_s22 }
   0xb   : > { %p81_p5 = scmp.eq.s32.totalorder %s717_s21, 0  ;;  %p65_p6 = scmp.eq.s32.totalorder %s64_s25, 0 }
   0xc   : > { %p829_p8 = scmp.lt.s32.totalorder %s1009_s20, 2  ;;  %s1094_s28 = sand.u32 1, %s997_s17  }
   0xd   : > { %p1085_p7 = por %p81_p5, %p80_p4  ;;  %s756_s29 = sshll.u32 %s1005_s19, 10 }
   0xe   : > { %s1091_s27 = scalar_select %p65_p6, %s997_s17, %s67_s23  }
   0xf   : > { %s721_s30 = sshll.u32 %s1094_s28, 6  ;;  %s207_s7 = scalar_lea.hbm %s1203_s1, %s756_s29 }
  0x10   : > { %s201_s8 = scalar_lea.vmem [#allocation2], %s721_s30  ;;  %p1105_p9 = pnand %p829_p8, %p1078_p3 }
  0x11   : > { %s208_s9 = sshll.u32 %s201_s8, 4  ;;  %s198_s11 = scalar_lea.sflag [#allocation3], %s1094_s28  ;;  %s209_s9 = int_to_ptr.vmem [resolvable:$true] %s208_s9 }
  0x12   : > { %p901_p10 = pneg %p1105_p9  ;;  %s912_s12 = scalar_lea.vmem %s209_s9, 1024 }
  0x13   : > { %p913_p11 = scmp.ne.s32.totalorder %s209_s9, %s912_s12  ;;  %s1011_s13 = smov [#allocation2]  }
  0x14   : > { %s917_s14 = sshll.u32 %s1011_s13, 4  ;;  %s918_s14 = int_to_ptr.vmem [resolvable:$false] %s917_s14 }
  0x15   : > { %p915_p12 = pnand %p913_p11, %p901_p10  ;;  %s919_s15 = scalar_lea.vmem %s918_s14, 2048 }
  0x16   : > { %p920_p0 = scmp.lt.s32.totalorder %s209_s9, %s918_s14  ;;  %p921_p1 = scmp.lt.s32.totalorder %s919_s15, %s912_s12 }
  0x17   : > { %p916_p13 = pneg %p915_p12 }
  0x18   : > { %p922_p2 = por %p921_p1, %p920_p0 }
  0x1a   : > { %p923_p3 = pnand %p922_p2, %p916_p13 }
  0x1c   : > { %926 = shalt.err (!%p923_p3)
}
  0x1d   : > { %s1012_s21 = smov 64   ;;  %s1013_s23 = smov 4  }
  0x1e   : > { %825 = dma.hbm_to_vmem [thread:$0]  (!%p1105_p9), %s207_s7, 1024, %s209_s9, %s198_s11, %s1012_s21, %s1012_s21, %s1013_s23  }
  0x1f   : > { %p727_p4 = scmp.ge.s32.totalorder %s1009_s20, 1  ;;  %p244_p5 = scmp.lt.s32.totalorder %s1009_s20, 3 }
  0x20   : > { %s228_s6 = scalar_lea.hbm %s1204_s2, %s756_s29  ;;  %s222_s8 = scalar_lea.vmem [#allocation4], %s721_s30 }
  0x21   : > { %p1119_p6 = pnand %p727_p4, %p244_p5  ;;  %s229_s12 = sshll.u32 %s222_s8, 4  ;;  %s230_s12 = int_to_ptr.vmem [resolvable:$true] %s229_s12 }
  0x22   : > { %s219_s13 = scalar_lea.sflag [#allocation5], %s1094_s28  ;;  %s940_s14 = scalar_lea.vmem %s230_s12, 1024 }
  0x23   : > { %p941_p8 = scmp.ne.s32.totalorder %s230_s12, %s940_s14  ;;  %s1014_s7 = smov [#allocation4]  }
  0x24   : > { %s945_s9 = sshll.u32 %s1014_s7, 4  ;;  %s946_s9 = int_to_ptr.vmem [resolvable:$false] %s945_s9 }
  0x25   : > { %p943_p11 = pnand %p941_p8, %p901_p10  ;;  %s947_s11 = scalar_lea.vmem %s946_s9, 2048 }
  0x26   : > { %p948_p13 = scmp.lt.s32.totalorder %s230_s12, %s946_s9  ;;  %p949_p0 = scmp.lt.s32.totalorder %s947_s11, %s940_s14 }
  0x27   : > { %p944_p12 = pneg %p943_p11 }
  0x28   : > { %p950_p1 = por %p949_p0, %p948_p13 }
  0x2a   : > { %p951_p2 = pnand %p950_p1, %p944_p12 }
  0x2c   : > { %954 = shalt.err (!%p951_p2)
}
  0x2d   : > { %828 = dma.hbm_to_vmem [thread:$0]  (!%p1105_p9), %s228_s6, 1024, %s230_s12, %s219_s13, %s1012_s21, %s1012_s21, %s1013_s23  }
  0x2e   : > { %248 = sbr.rel (%p1119_p6) target bundleno = 491 (0x1eb), region = 36  ;;  %s250_s28 = sand.u32 (!%p1119_p6), 1, %s993_s16  }
  0x2f   : > { %s728_s29 = sshll.u32 (!%p1119_p6), %s250_s28, 6  ;;  %s251_s30 = scalar_lea.sflag (!%p1119_p6), [#allocation3], %s250_s28 }
  0x30   : > { %s1137_s15 = scalar_lea.vmem (!%p1119_p6), [#allocation2], %s728_s29 }
  0x33   : > { %980 = dma.done.wait (%p1085_p7), %s251_s30, 1024  }
  0x34   : > { %982 = vsyncadd (%p1085_p7), %s251_s30, 4294966272  ;;  %s260_s25 = scalar_lea.sflag [#allocation5], %s250_s28  ;;  %s1143_s5 = scalar_lea.vmem [#allocation4], %s728_s29 }
  0x35   : > { %984 = dma.done.wait (%p1085_p7), %s260_s25, 1024  }
  0x36   : > { %986 = vsyncadd (%p1085_p7), %s260_s25, 4294966272  ;;  %v1015_v0 = vmov 0.0   ;;  %vm1016_vm0 = vmmov 0   ;;  %p311_p9 = scmp.lt.s32.totalorder %s1001_s18, 1  ;;  %v882_v1 = vld [vmem:[%s1137_s15 + $0x38] sm:$0xff]   ;;  %v883_v2 = vld [vmem:[%s1137_s15 + $0x30] sm:$0xff]  }
  0x37   : > { %778 = vmatprep.subr.bf16.mxu0 %v1015_v0  ;;  %794 = vmatprep.mubr.msk.bf16.mxu0 %vm1016_vm0, %v1015_v0  ;;  %v884_v3 = vld [vmem:[%s1137_s15 + $0x28] sm:$0xff]   ;;  %v891_v4 = vld [vmem:[%s1143_s5 + $0x38] sm:$0xff]   ;;  %v885_v5 = vld [vmem:[%s1137_s15 + $0x20] sm:$0xff]  }
  0x38   : > { %798 = vmatprep.subr.bf16.mxu1 %v1015_v0  ;;  %814 = vmatprep.mubr.msk.bf16.mxu1 %vm1016_vm0, %v1015_v0  ;;  %s1219_s18 = smov (!%p311_p9, %s1001_s18), 1  ;;  %v892_v6 = vld [vmem:[%s1143_s5 + $0x30] sm:$0xff]   ;;  %v886_v7 = vld [vmem:[%s1137_s15 + $0x18] sm:$0xff]   ;;  %v893_v8 = vld [vmem:[%s1143_s5 + $0x28] sm:$0xff]  }
  0x39   : > { %779 = vmatpush3.bf16.msra.mxu0 %v882_v1  ;;  %s758_s26 = sshll.u32 %s1219_s18, 3  ;;  %799 = vmatpush3.bf16.msra.mxu1 %v891_v4  ;;  %v887_v9 = vld [vmem:[%s1137_s15 + $0x10] sm:$0xff]   ;;  %v894_v10 = vld [vmem:[%s1143_s5 + $0x20] sm:$0xff]   ;;  %v888_v11 = vld [vmem:[%s1137_s15 + $0x8] sm:$0xff]   ;;  %s732_s24 = sshll.u32 %s1219_s18, 1 }
  0x3a   : > { %780 = vmatprep.subr.bf16.mxu0 %v1015_v0  ;;  %s1160_s23 = scalar_lea.vmem %s1202_s0, %s758_s26  ;;  %800 = vmatprep.subr.bf16.mxu1 %v1015_v0  ;;  %v895_v12 = vld [vmem:[%s1143_s5 + $0x18] sm:$0xff]   ;;  %v889_v13 = vld [vmem:[%s1137_s15] sm:$0xff]   ;;  %v896_v15 = vld [vmem:[%s1143_s5 + $0x10] sm:$0xff]   ;;  %s323_s12 = scalar_lea.vmem %s1205_s3, %s732_s24 }
  0x3b   : > { %v890_v14 = vld [vmem:[%s1160_s23] sm:$0xff]   ;;  %v897_v16 = vld [vmem:[%s1143_s5 + $0x8] sm:$0xff]   ;;  %s759_s13 = sshll.u32 %s1219_s18, 4 }
  0x3c   : > { %v898_v17 = vld [vmem:[%s1143_s5] sm:$0xff]   ;;  %s332_s9 = scalar_lea.vmem %s1206_s4, %s759_s13 }
  0x3d   : > { %781 = vmatpush3.bf16.msra.mxu0 %v883_v2  ;;  %801 = vmatpush3.bf16.msra.mxu1 %v892_v6  ;;  %v735_v18 = vld [vmem:[%s323_s12] ss:$0 sm:$0xff]  ;;  %v745_v28 = vld [vmem:[%s323_s12 + $0x1] ss:$0 sm:$0xff] }
  0x3e   : > { %782 = vmatprep.subr.bf16.mxu0 %v1015_v0  ;;  %802 = vmatprep.subr.bf16.mxu1 %v1015_v0 }
  0x41   : > { %783 = vmatpush3.bf16.msra.mxu0 %v884_v3  ;;  %803 = vmatpush3.bf16.msra.mxu1 %v893_v8 }
  0x42   : > { %784 = vmatprep.subr.bf16.mxu0 %v1015_v0  ;;  %804 = vmatprep.subr.bf16.mxu1 %v1015_v0 }
  0x45   : > { %785 = vmatpush3.bf16.msra.mxu0 %v885_v5  ;;  %805 = vmatpush3.bf16.msra.mxu1 %v894_v10 }
  0x46   : > { %786 = vmatprep.subr.bf16.mxu0 %v1015_v0  ;;  %806 = vmatprep.subr.bf16.mxu1 %v1015_v0 }
  0x49   : > { %787 = vmatpush3.bf16.msra.mxu0 %v886_v7  ;;  %807 = vmatpush3.bf16.msra.mxu1 %v895_v12 }
  0x4a   : > { %788 = vmatprep.subr.bf16.mxu0 %v1015_v0  ;;  %808 = vmatprep.subr.bf16.mxu1 %v1015_v0 }
  0x4d   : > { %789 = vmatpush3.bf16.msra.mxu0 %v887_v9  ;;  %809 = vmatpush3.bf16.msra.mxu1 %v896_v15 }
  0x4e   : > { %790 = vmatprep.subr.bf16.mxu0 %v1015_v0  ;;  %810 = vmatprep.subr.bf16.mxu1 %v1015_v0 }
  0x51   : > { %791 = vmatpush3.bf16.msra.mxu0 %v888_v11  ;;  %811 = vmatpush3.bf16.msra.mxu1 %v897_v16 }
  0x52   : > { %792 = vmatprep.subr.bf16.mxu0 %v1015_v0  ;;  %812 = vmatprep.subr.bf16.mxu1 %v1015_v0 }
  0x55   : > { %793 = vmatpush3.bf16.msra.mxu0 %v889_v13  ;;  %813 = vmatpush3.bf16.msra.mxu1 %v898_v17 }
  0x58   : > { %795 = vmatmul.mubr.bf16.vlgmr.msra.gmra.mxu0 %v890_v14 }
 0x118   : > { %v449_v19 = vpop.f32.mrf.mxu0 }
 0x119   : > { %v450_v21 = vadd.f32 %v735_v18, %v449_v19 }
 0x11a   : > { %v796_v20 = vpop.f32.mrf.mxu0 }
 0x11b   : > { %v456_v25 = vmax.f32 %v450_v21, 0.0 }
 0x11c   : > { %v452_v22 = vpop.f32.mrf.mxu0 }
 0x11d   : > { %v453_v23 = vadd.f32 %v735_v18, %v452_v22 }
 0x11e   : > { %v797_v24 = vpop.f32.mrf.mxu0 }
 0x11f   : > { %v457_v26 = vmax.f32 %v453_v23, 0.0 }
 0x121   : > { %v458_v27 = vpack.c.bf16 %v457_v26, %v456_v25 }
 0x123   : > { %815 = vmatmul.mubr.bf16.vlgmr.msra.gmra.mxu1 %v458_v27 }
 0x1e3   : > { %v563_v29 = vpop.f32.mrf.mxu1 }
 0x1e4   : > { %v564_v30 = vadd.f32 %v745_v28, %v563_v29 }
 0x1e5   : > { %v816_v31 = vpop.f32.mrf.mxu1 }
 0x1e6   : > { %570 = vst [vmem:[%s332_s9] sm:$0xff] %v564_v30 }
 0x1e7   : > { %v566_v32 = vpop.f32.mrf.mxu1 }
 0x1e8   : > { %v567_v33 = vadd.f32 %v745_v28, %v566_v32 }
 0x1e9   : > { %v817_v34 = vpop.f32.mrf.mxu1 }
 0x1ea   : > { %571 = vst [vmem:[%s332_s9 + $0x8] sm:$0xff] %v567_v33 }
 0x1eb PF: > { %s20_s20 = sadd.s32 1, %s1009_s20   ;;  %s1211_s15 = smov %s993_s16 }
 0x1ec   : > { %p17_p7 = scmp.ge.s32.totalorder %s20_s20, 4   ;;  %s1212_s16 = smov %s997_s17 }
 0x1ed   : > { %s1213_s17 = smov %s1091_s27  ;;  %s1214_s18 = smov %s1005_s19 }
 0x1ee   : > { %s1215_s19 = smov %s1217_s22  ;;  %19 = sbr.rel (!%p17_p7) target bundleno = 6 (0x6), region = 95 }
 0x1f3   :  { %602 = vsyncpa [#allocation3], 1 }
 0x1f4   :  { %604 = vsyncpa [#allocation3 + $0x1], 1 }
 0x1f5   :  { %605 = vsyncpa [#allocation5], 1 }
 0x1f6   :  { %607 = vsyncpa [#allocation5 + $0x1], 1 }

</bundles_post_ra>
